<compile_context>
chip_gen: v6e
topology: v6e:2x2x1
jax: 0.10.0
libtpu: 0.0.40
codegen_flags: <defaults>
</compile_context>

<pallas_src>
import functools

import jax
import jax.numpy as jnp
from jax.experimental import pallas as pl
from jax.experimental.pallas import tpu as pltpu


# --------------------------------------------------------------------------- #
# Kernel
# --------------------------------------------------------------------------- #
def _make_kernel(tm, compute_dtype, split_subtiles):
    """Builds the fused 5-Linear (Tanh x4) + Dirichlet-blend kernel for one TM-row block."""

    def mlp_chain(x, w_refs, b_refs):
        h = x.astype(compute_dtype)
        for li in range(4):
            z = jnp.dot(h, w_refs[li][...], preferred_element_type=jnp.float32) + b_refs[li][...]
            # tanh / bias-add stay f32 (v5e VPU/EUP have no bf16); cast only the matmul operand.
            h = jnp.tanh(z).astype(compute_dtype)
        return jnp.dot(h, w_refs[4][...], preferred_element_type=jnp.float32) + b_refs[4][...]

    def kernel(g_ref, d_ref, x_ref,
               w0_ref, b0_ref, w1_ref, b1_ref, w2_ref, b2_ref,
               w3_ref, b3_ref, w4_ref, b4_ref, o_ref):
        w_refs = (w0_ref, w1_ref, w2_ref, w3_ref, w4_ref)
        b_refs = (b0_ref, b1_ref, b2_ref, b3_ref, b4_ref)
        g = g_ref[0, 0]
        d = d_ref[0, 0]
        x = x_ref[...]
        if split_subtiles:
            # Two independent row sub-tiles: the MXU matmuls of one sub-tile can
            # co-issue with the EUP tanh of the other (different VLIW slots)
            # instead of serializing MXU -> EUP every layer.
            half = tm // 2
            o_ref[:half, :] = g + d * mlp_chain(x[:half, :], w_refs, b_refs)
            o_ref[half:, :] = g + d * mlp_chain(x[half:, :], w_refs, b_refs)
        else:
            o_ref[...] = g + d * mlp_chain(x, w_refs, b_refs)

    return kernel


# --------------------------------------------------------------------------- #
# Wrapper
# --------------------------------------------------------------------------- #
def _choose_row_tile(batch, tm_max):
    """Adaptive row tile: pad only to the 8-row f32 sublane granularity, cap at tm_max,
    and prefer >= 2 row blocks so the 'parallel' axis can shard across v7x TensorCores."""
    rows = max(8, pl.cdiv(batch, 8) * 8)
    tm = max(8, (min(tm_max, rows) // 8) * 8)
    if rows >= 16 and pl.cdiv(rows, tm) < 2:
        tm = pl.cdiv(pl.cdiv(rows, 2), 8) * 8        # split into two 8-aligned blocks
    m_pad = pl.cdiv(rows, tm) * tm
    return tm, m_pad


@functools.partial(jax.jit, static_argnames=("output_dim", "tm_max", "use_bf16"))
def sdof_pinn_forward(t, params, output_dim, G=0.0, D=1.0, *, tm_max=512, use_bf16=False):
    """t: (B, seq_len, input_dim) -> (B, seq_len, output_dim)."""
    B, S, n_in = t.shape
    in_flat = S * n_in
    hid_flat = params[0][0].shape[1]
    out_flat = output_dim * S
    out_pad = max(128, pl.cdiv(out_flat, 128) * 128)          # lane-dense output width

    tm, m_pad = _choose_row_tile(B, tm_max)
    compute_dtype = jnp.bfloat16 if use_bf16 else jnp.float32
    split_subtiles = (tm >= 16) and (tm % 16 == 0)

    # nn.Flatten(start_dim=1); zero-pad rows only up to the adaptive row tile.
    x = t.reshape(B, in_flat).astype(jnp.float32)
    if m_pad != B:
        x = jnp.pad(x, ((0, m_pad - B), (0, 0)))

    (w0, b0), (w1, b1), (w2, b2), (w3, b3), (w4, b4) = params
    # Pad the last projection to a full 128-lane width (unmasked vst); extra cols sliced off.
    w4p = jnp.pad(w4.astype(jnp.float32), ((0, 0), (0, out_pad - out_flat)))
    b4p = jnp.pad(b4.astype(jnp.float32), ((0, 0), (0, out_pad - out_flat)))

    ws = [w.astype(compute_dtype) for w in (w0, w1, w2, w3, w4p)]
    bs = [b.astype(jnp.float32) for b in (b0, b1, b2, b3, b4p)]

    g_arr = jnp.full((1, 1), G, dtype=jnp.float32)
    d_arr = jnp.full((1, 1), D, dtype=jnp.float32)

    row_map = lambda i: (i, 0)
    const2 = lambda i: (0, 0)

    def resident(shape):
        # Constant index_map => block stays VMEM-resident across the whole row grid;
        # single-buffered (no point double-buffering a block that never changes).
        return pl.BlockSpec(shape, const2, pipeline_mode=pl.Buffered(1))

    smem_scalar = pl.BlockSpec(memory_space=pltpu.MemorySpace.SMEM)

    in_specs = [
        smem_scalar,                                  # G
        smem_scalar,                                  # D
        pl.BlockSpec((tm, in_flat), row_map),         # x rows (double-buffered stream)
        resident((in_flat, hid_flat)),  resident((1, hid_flat)),    # W0, b0
        resident((hid_flat, hid_flat)), resident((1, hid_flat)),    # W1, b1
        resident((hid_flat, hid_flat)), resident((1, hid_flat)),    # W2, b2
        resident((hid_flat, hid_flat)), resident((1, hid_flat)),    # W3, b3
        resident((hid_flat, out_pad)),  resident((1, out_pad)),     # W4, b4 (lane-padded)
    ]

    weight_bytes = sum(int(a.size) * a.dtype.itemsize for a in ws + bs)
    flops = 2 * m_pad * (in_flat * hid_flat + 3 * hid_flat * hid_flat + hid_flat * out_pad)
    cost = pl.CostEstimate(
        flops=flops,
        transcendentals=4 * m_pad * hid_flat,
        bytes_accessed=4 * (m_pad * in_flat + m_pad * out_pad) + weight_bytes,
    )

    out_padded = pl.pallas_call(
        _make_kernel(tm, compute_dtype, split_subtiles),
        out_shape=jax.ShapeDtypeStruct((m_pad, out_pad), jnp.float32),
        grid=(m_pad // tm,),
        in_specs=in_specs,
        out_specs=pl.BlockSpec((tm, out_pad), row_map),
        compiler_params=pltpu.CompilerParams(
            dimension_semantics=("parallel",),        # row blocks shard across v7x TCs
        ),
        cost_estimate=cost,
    )(g_arr, d_arr, x,
      ws[0], bs[0], ws[1], bs[1], ws[2], bs[2], ws[3], bs[3], ws[4], bs[4])

    # TODO(synk): for very large batches, fuse the downstream consumer (or pack 8
    # row-groups' 16 real columns into the 128 output lanes) so this slice over the
    # 8x lane-padded output does not cost an extra HBM pass.
    # Slice off row / lane padding, then nn.Unflatten(dim=1, (seq_len, n_output)).
    return out_padded[:B, :out_flat].reshape(B, S, output_dim)


# --------------------------------------------------------------------------- #
# Params + pure-JAX reference
# --------------------------------------------------------------------------- #
def init_params(key, input_dim, hidden_dim, output_dim, seq_len):
    """Deterministic init matching the PyTorch layer shapes (Linear default U(-1/sqrt(in), 1/sqrt(in)))."""
    in_flat = input_dim * seq_len
    hid_flat = hidden_dim * seq_len
    out_flat = output_dim * seq_len
    dims = [(in_flat, hid_flat), (hid_flat, hid_flat), (hid_flat, hid_flat),
            (hid_flat, hid_flat), (hid_flat, out_flat)]
    params = []
    for (din, dout) in dims:
        key, kw, kb = jax.random.split(key, 3)
        bound = 1.0 / jnp.sqrt(jnp.float32(din))
        w = jax.random.uniform(kw, (din, dout), jnp.float32, -bound, bound)
        b = jax.random.uniform(kb, (1, dout), jnp.float32, -bound, bound)
        params.append((w, b))
    return params


def reference_forward(t, params, output_dim, G=0.0, D=1.0):
    B, S, n_in = t.shape
    h = t.reshape(B, S * n_in).astype(jnp.float32)
    for i, (w, b) in enumerate(params):
        h = h @ w + b
        if i < len(params) - 1:
            h = jnp.tanh(h)
    return (G + D * h).reshape(B, S, output_dim)


# --------------------------------------------------------------------------- #
# Self-test
# --------------------------------------------------------------------------- #
if __name__ == "__main__":
    # Module hyper-parameters (small, consistent with the PyTorch module):
    input_dim, hidden_dim, output_dim, seq_len = 1, 32, 2, 8

    key = jax.random.PRNGKey(0)
    key, kparam, kt = jax.random.split(key, 3)
    params = init_params(kparam, input_dim, hidden_dim, output_dim, seq_len)

    # TODO(synk): configure()/loss_func() (physical system matrices, autograd ODE
    # residuals, sorting, loss weighting) are training-time host logic, not part of
    # the forward hot path, and are not implemented as a kernel.

    # --- shipped tiny batch: rows pad to 8 (not 256), single 8-row block ---
    batch = 4
    t = jax.random.normal(kt, (batch, seq_len, input_dim), dtype=jnp.float32)
    y = jax.block_until_ready(sdof_pinn_forward(t, params, output_dim, G=0.0, D=1.0))
    y_ref = reference_forward(t, params, output_dim, G=0.0, D=1.0)
    assert y.shape == (batch, seq_len, output_dim)
    assert jnp.allclose(y, y_ref, atol=1e-4, rtol=1e-4), "f32 small-batch mismatch vs reference"

    # --- larger batch: 2 row blocks (v7x megacore) + intra-kernel MXU/EUP sub-tile interleave ---
    key, kt2 = jax.random.split(key)
    t2 = jax.random.normal(kt2, (64, seq_len, input_dim), dtype=jnp.float32)
    y2 = jax.block_until_ready(sdof_pinn_forward(t2, params, output_dim, G=0.5, D=2.0))
    y2_ref = reference_forward(t2, params, output_dim, G=0.5, D=2.0)
    assert jnp.allclose(y2, y2_ref, atol=1e-4, rtol=1e-4), "f32 large-batch mismatch vs reference"

    # --- bf16 matmul path (full MXU rate + halved weight DMA on v6e/v7x; tanh kept f32) ---
    y3 = jax.block_until_ready(
        sdof_pinn_forward(t2, params, output_dim, G=0.0, D=1.0, use_bf16=True))
    y3_ref = reference_forward(t2, params, output_dim, G=0.0, D=1.0)
    assert jnp.allclose(y3, y3_ref, atol=5e-2, rtol=5e-2), "bf16 mismatch vs reference"

    print("KERNEL_OK")
</pallas_src>

<mosaic_0001>
module attributes {stable_mosaic.version = 11 : i64} {
  func.func @kernel(%arg0: i32, %arg1: memref<1x1xf32, #tpu.memory_space<smem>>, %arg2: memref<1x1xf32, #tpu.memory_space<smem>>, %arg3: memref<8x8xf32, #tpu.memory_space<vmem>>, %arg4: memref<8x256xf32, #tpu.memory_space<vmem>>, %arg5: memref<1x256xf32, #tpu.memory_space<vmem>>, %arg6: memref<256x256xf32, #tpu.memory_space<vmem>>, %arg7: memref<1x256xf32, #tpu.memory_space<vmem>>, %arg8: memref<256x256xf32, #tpu.memory_space<vmem>>, %arg9: memref<1x256xf32, #tpu.memory_space<vmem>>, %arg10: memref<256x256xf32, #tpu.memory_space<vmem>>, %arg11: memref<1x256xf32, #tpu.memory_space<vmem>>, %arg12: memref<256x128xf32, #tpu.memory_space<vmem>>, %arg13: memref<1x128xf32, #tpu.memory_space<vmem>>, %arg14: memref<8x128xf32, #tpu.memory_space<vmem>>) attributes {dimension_semantics = [#tpu.dimension_semantics<parallel>], iteration_bounds = array<i64: 1>, scalar_prefetch = 0 : i64, scratch_operands = 0 : i64, tpu.core_type = #tpu.core_type<tc>, window_params = [{transform_indices = @transform_0, window_bounds = array<i64: 1, 1>}, {transform_indices = @transform_1, window_bounds = array<i64: 1, 1>}, {transform_indices = @transform_2, window_bounds = array<i64: 8, 8>}, {pipeline_mode = #tpu.pipeline_mode<synchronous>, transform_indices = @transform_3, window_bounds = array<i64: 8, 256>}, {pipeline_mode = #tpu.pipeline_mode<synchronous>, transform_indices = @transform_4, window_bounds = array<i64: 1, 256>}, {pipeline_mode = #tpu.pipeline_mode<synchronous>, transform_indices = @transform_5, window_bounds = array<i64: 256, 256>}, {pipeline_mode = #tpu.pipeline_mode<synchronous>, transform_indices = @transform_6, window_bounds = array<i64: 1, 256>}, {pipeline_mode = #tpu.pipeline_mode<synchronous>, transform_indices = @transform_7, window_bounds = array<i64: 256, 256>}, {pipeline_mode = #tpu.pipeline_mode<synchronous>, transform_indices = @transform_8, window_bounds = array<i64: 1, 256>}, {pipeline_mode = #tpu.pipeline_mode<synchronous>, transform_indices = @transform_9, window_bounds = array<i64: 256, 256>}, {pipeline_mode = #tpu.pipeline_mode<synchronous>, transform_indices = @transform_10, window_bounds = array<i64: 1, 256>}, {pipeline_mode = #tpu.pipeline_mode<synchronous>, transform_indices = @transform_11, window_bounds = array<i64: 256, 128>}, {pipeline_mode = #tpu.pipeline_mode<synchronous>, transform_indices = @transform_12, window_bounds = array<i64: 1, 128>}, {transform_indices = @transform_13, window_bounds = array<i64: 8, 128>}]} {
    %c0 = arith.constant 0 : index
    %c0_0 = arith.constant 0 : index
    %0 = memref.load %arg1[%c0, %c0_0] : memref<1x1xf32, #tpu.memory_space<smem>>
    %c0_1 = arith.constant 0 : index
    %c0_2 = arith.constant 0 : index
    %1 = memref.load %arg2[%c0_1, %c0_2] : memref<1x1xf32, #tpu.memory_space<smem>>
    %c0_3 = arith.constant 0 : index
    %c0_4 = arith.constant 0 : index
    %2 = vector.load %arg3[%c0_3, %c0_4] : memref<8x8xf32, #tpu.memory_space<vmem>>, vector<8x8xf32>
    %c0_5 = arith.constant 0 : index
    %c0_6 = arith.constant 0 : index
    %3 = vector.load %arg4[%c0_5, %c0_6] : memref<8x256xf32, #tpu.memory_space<vmem>>, vector<8x256xf32>
    %cst = arith.constant dense<0.000000e+00> : vector<8x256xf32>
    %4 = tpu.matmul %2, %3, %cst {dimension_numbers = #tpu.dot_dimension_numbers<[1], [0], [0], [1], [0, 0, 1, 1], [], []>} : vector<8x8xf32>, vector<8x256xf32>, vector<8x256xf32> -> vector<8x256xf32>
    %c0_7 = arith.constant 0 : index
    %c0_8 = arith.constant 0 : index
    %5 = vector.load %arg5[%c0_7, %c0_8] : memref<1x256xf32, #tpu.memory_space<vmem>>, vector<1x256xf32>
    %6 = vector.broadcast %5 : vector<1x256xf32> to vector<8x256xf32>
    %7 = arith.addf %4, %6 : vector<8x256xf32>
    %8 = math.tanh %7 : vector<8x256xf32>
    %c0_9 = arith.constant 0 : index
    %c0_10 = arith.constant 0 : index
    %9 = vector.load %arg6[%c0_9, %c0_10] : memref<256x256xf32, #tpu.memory_space<vmem>>, vector<256x256xf32>
    %cst_11 = arith.constant dense<0.000000e+00> : vector<8x256xf32>
    %10 = tpu.matmul %8, %9, %cst_11 {dimension_numbers = #tpu.dot_dimension_numbers<[1], [0], [0], [1], [0, 0, 1, 1], [], []>} : vector<8x256xf32>, vector<256x256xf32>, vector<8x256xf32> -> vector<8x256xf32>
    %c0_12 = arith.constant 0 : index
    %c0_13 = arith.constant 0 : index
    %11 = vector.load %arg7[%c0_12, %c0_13] : memref<1x256xf32, #tpu.memory_space<vmem>>, vector<1x256xf32>
    %12 = vector.broadcast %11 : vector<1x256xf32> to vector<8x256xf32>
    %13 = arith.addf %10, %12 : vector<8x256xf32>
    %14 = math.tanh %13 : vector<8x256xf32>
    %c0_14 = arith.constant 0 : index
    %c0_15 = arith.constant 0 : index
    %15 = vector.load %arg8[%c0_14, %c0_15] : memref<256x256xf32, #tpu.memory_space<vmem>>, vector<256x256xf32>
    %cst_16 = arith.constant dense<0.000000e+00> : vector<8x256xf32>
    %16 = tpu.matmul %14, %15, %cst_16 {dimension_numbers = #tpu.dot_dimension_numbers<[1], [0], [0], [1], [0, 0, 1, 1], [], []>} : vector<8x256xf32>, vector<256x256xf32>, vector<8x256xf32> -> vector<8x256xf32>
    %c0_17 = arith.constant 0 : index
    %c0_18 = arith.constant 0 : index
    %17 = vector.load %arg9[%c0_17, %c0_18] : memref<1x256xf32, #tpu.memory_space<vmem>>, vector<1x256xf32>
    %18 = vector.broadcast %17 : vector<1x256xf32> to vector<8x256xf32>
    %19 = arith.addf %16, %18 : vector<8x256xf32>
    %20 = math.tanh %19 : vector<8x256xf32>
    %c0_19 = arith.constant 0 : index
    %c0_20 = arith.constant 0 : index
    %21 = vector.load %arg10[%c0_19, %c0_20] : memref<256x256xf32, #tpu.memory_space<vmem>>, vector<256x256xf32>
    %cst_21 = arith.constant dense<0.000000e+00> : vector<8x256xf32>
    %22 = tpu.matmul %20, %21, %cst_21 {dimension_numbers = #tpu.dot_dimension_numbers<[1], [0], [0], [1], [0, 0, 1, 1], [], []>} : vector<8x256xf32>, vector<256x256xf32>, vector<8x256xf32> -> vector<8x256xf32>
    %c0_22 = arith.constant 0 : index
    %c0_23 = arith.constant 0 : index
    %23 = vector.load %arg11[%c0_22, %c0_23] : memref<1x256xf32, #tpu.memory_space<vmem>>, vector<1x256xf32>
    %24 = vector.broadcast %23 : vector<1x256xf32> to vector<8x256xf32>
    %25 = arith.addf %22, %24 : vector<8x256xf32>
    %26 = math.tanh %25 : vector<8x256xf32>
    %c0_24 = arith.constant 0 : index
    %c0_25 = arith.constant 0 : index
    %27 = vector.load %arg12[%c0_24, %c0_25] : memref<256x128xf32, #tpu.memory_space<vmem>>, vector<256x128xf32>
    %cst_26 = arith.constant dense<0.000000e+00> : vector<8x128xf32>
    %28 = tpu.matmul %26, %27, %cst_26 {dimension_numbers = #tpu.dot_dimension_numbers<[1], [0], [0], [1], [0, 0, 1, 1], [], []>} : vector<8x256xf32>, vector<256x128xf32>, vector<8x128xf32> -> vector<8x128xf32>
    %c0_27 = arith.constant 0 : index
    %c0_28 = arith.constant 0 : index
    %29 = vector.load %arg13[%c0_27, %c0_28] : memref<1x128xf32, #tpu.memory_space<vmem>>, vector<1x128xf32>
    %30 = vector.broadcast %29 : vector<1x128xf32> to vector<8x128xf32>
    %31 = arith.addf %28, %30 : vector<8x128xf32>
    %32 = vector.broadcast %1 : f32 to vector<8x128xf32>
    %33 = arith.mulf %32, %31 : vector<8x128xf32>
    %34 = vector.broadcast %0 : f32 to vector<8x128xf32>
    %35 = arith.addf %34, %33 : vector<8x128xf32>
    %c0_29 = arith.constant 0 : index
    %c0_30 = arith.constant 0 : index
    %36 = vector.load %arg14[%c0_29, %c0_30] : memref<8x128xf32, #tpu.memory_space<vmem>>, vector<8x128xf32>
    tpu.vector_store %arg14[%c0_29, %c0_30], %35 {strides = array<i32>} : memref<8x128xf32, #tpu.memory_space<vmem>>, vector<8x128xf32>,
    return
  }
  func.func @transform_0(%arg0: i32) -> (i32, i32) {
    %c0_i32 = arith.constant 0 : i32
    %c0_i32_0 = arith.constant 0 : i32
    %c0_i32_1 = arith.constant 0 : i32
    return %c0_i32, %c0_i32_0 : i32, i32
  }
  func.func @transform_1(%arg0: i32) -> (i32, i32) {
    %c0_i32 = arith.constant 0 : i32
    %c0_i32_0 = arith.constant 0 : i32
    %c0_i32_1 = arith.constant 0 : i32
    return %c0_i32, %c0_i32_0 : i32, i32
  }
  func.func @transform_2(%arg0: i32) -> (i32, i32) {
    %c0_i32 = arith.constant 0 : i32
    %c0_i32_0 = arith.constant 0 : i32
    return %arg0, %c0_i32 : i32, i32
  }
  func.func @transform_3(%arg0: i32) -> (i32, i32) {
    %c0_i32 = arith.constant 0 : i32
    %c0_i32_0 = arith.constant 0 : i32
    %c0_i32_1 = arith.constant 0 : i32
    return %c0_i32, %c0_i32_0 : i32, i32
  }
  func.func @transform_4(%arg0: i32) -> (i32, i32) {
    %c0_i32 = arith.constant 0 : i32
    %c0_i32_0 = arith.constant 0 : i32
    %c0_i32_1 = arith.constant 0 : i32
    return %c0_i32, %c0_i32_0 : i32, i32
  }
  func.func @transform_5(%arg0: i32) -> (i32, i32) {
    %c0_i32 = arith.constant 0 : i32
    %c0_i32_0 = arith.constant 0 : i32
    %c0_i32_1 = arith.constant 0 : i32
    return %c0_i32, %c0_i32_0 : i32, i32
  }
  func.func @transform_6(%arg0: i32) -> (i32, i32) {
    %c0_i32 = arith.constant 0 : i32
    %c0_i32_0 = arith.constant 0 : i32
    %c0_i32_1 = arith.constant 0 : i32
    return %c0_i32, %c0_i32_0 : i32, i32
  }
  func.func @transform_7(%arg0: i32) -> (i32, i32) {
    %c0_i32 = arith.constant 0 : i32
    %c0_i32_0 = arith.constant 0 : i32
    %c0_i32_1 = arith.constant 0 : i32
    return %c0_i32, %c0_i32_0 : i32, i32
  }
  func.func @transform_8(%arg0: i32) -> (i32, i32) {
    %c0_i32 = arith.constant 0 : i32
    %c0_i32_0 = arith.constant 0 : i32
    %c0_i32_1 = arith.constant 0 : i32
    return %c0_i32, %c0_i32_0 : i32, i32
  }
  func.func @transform_9(%arg0: i32) -> (i32, i32) {
    %c0_i32 = arith.constant 0 : i32
    %c0_i32_0 = arith.constant 0 : i32
    %c0_i32_1 = arith.constant 0 : i32
    return %c0_i32, %c0_i32_0 : i32, i32
  }
  func.func @transform_10(%arg0: i32) -> (i32, i32) {
    %c0_i32 = arith.constant 0 : i32
    %c0_i32_0 = arith.constant 0 : i32
    %c0_i32_1 = arith.constant 0 : i32
    return %c0_i32, %c0_i32_0 : i32, i32
  }
  func.func @transform_11(%arg0: i32) -> (i32, i32) {
    %c0_i32 = arith.constant 0 : i32
    %c0_i32_0 = arith.constant 0 : i32
    %c0_i32_1 = arith.constant 0 : i32
    return %c0_i32, %c0_i32_0 : i32, i32
  }
  func.func @transform_12(%arg0: i32) -> (i32, i32) {
    %c0_i32 = arith.constant 0 : i32
    %c0_i32_0 = arith.constant 0 : i32
    %c0_i32_1 = arith.constant 0 : i32
    return %c0_i32, %c0_i32_0 : i32, i32
  }
  func.func @transform_13(%arg0: i32) -> (i32, i32) {
    %c0_i32 = arith.constant 0 : i32
    %c0_i32_0 = arith.constant 0 : i32
    return %arg0, %c0_i32 : i32, i32
  }
}

</mosaic_0001>

<bundles_post_ra>
// kernel: sdof_pinn_forward.1
= control target key start
LH: loop header
LB: loop body
LE: loop exit
PB: predicated region body
PF: predicated region fallthrough
CT: control target
= control target key end

     0   :  { %20 = vsyncpa [#allocation5], 0  ;;  %s1251_s0 = inlined_call_operand.<no memory space> [shape: f32[1,1], index: 0, kind: input, shape index: {}]   ;;  %s1252_s1 = inlined_call_operand.<no memory space> [shape: f32[1,1], index: 1, kind: input, shape index: {}]   ;;  %s1253_s2 = inlined_call_operand.vmem [shape: f32[8,8], index: 2, kind: input, shape index: {}]   ;;  %s1254_s3 = inlined_call_operand.vmem [shape: f32[8,256], index: 3, kind: input, shape index: {}]   ;;  %s1255_s4 = inlined_call_operand.vmem [shape: f32[1,256], index: 4, kind: input, shape index: {}]   ;;  %s1256_s5 = inlined_call_operand.vmem [shape: f32[256,256], index: 5, kind: input, shape index: {}]   ;;  %s1257_s6 = inlined_call_operand.vmem [shape: f32[1,256], index: 6, kind: input, shape index: {}]   ;;  %s1258_s7 = inlined_call_operand.hbm [shape: f32[256,256], index: 7, kind: input, shape index: {}]   ;;  %s1259_s8 = inlined_call_operand.vmem [shape: f32[1,256], index: 8, kind: input, shape index: {}]   ;;  %s1260_s9 = inlined_call_operand.hbm [shape: f32[256,256], index: 9, kind: input, shape index: {}]   ;;  %s1261_s10 = inlined_call_operand.vmem [shape: f32[1,256], index: 10, kind: input, shape index: {}]   ;;  %s1262_s11 = inlined_call_operand.vmem [shape: f32[256,128], index: 11, kind: input, shape index: {}]   ;;  %s1263_s12 = inlined_call_operand.vmem [shape: f32[1,128], index: 12, kind: input, shape index: {}]   ;;  %s1264_s13 = inlined_call_operand.vmem [shape: f32[8,128], index: 13, kind: output, shape index: {}]  }
   0x1   :  { %21 = vsyncpa [#allocation7], 0  ;;  %s837_s25 = smov [#allocation4]  }
   0x2   :  { %s41_s26 = sshll.u32 %s837_s25, 4  ;;  %s42_s26 = int_to_ptr.vmem [resolvable:$true] %s41_s26 }
   0x3   :  { %s801_s27 = scalar_lea.vmem %s42_s26, 8192  ;;  %p806_p1 = scmp.lt.s32.totalorder %s42_s26, %s42_s26 }
   0x4   :  { %p802_p0 = scmp.ne.s32.totalorder %s42_s26, %s801_s27  ;;  %p807_p2 = scmp.lt.s32.totalorder %s801_s27, %s801_s27 }
   0x6   :  { %p808_p3 = por %p807_p2, %p806_p1 }
   0x8   :  { %p809_p4 = pnand %p808_p3, %p802_p0 }
   0xa   :  { %812 = shalt.err (!%p809_p4)
}
   0xb   :  { %s838_s28 = smov 256   ;;  %s839_s29 = smov 16  }
   0xc   :  { %47 = dma.hbm_to_vmem [thread:$0]  %s1258_s7, 8192, %s42_s26, [#allocation5], %s838_s28, %s838_s28, %s839_s29  }
   0xd   :  { %s840_s15 = smov [#allocation6]  }
   0xe   :  { %s55_s16 = sshll.u32 %s840_s15, 4  ;;  %s56_s16 = int_to_ptr.vmem [resolvable:$true] %s55_s16 }
   0xf   :  { %s821_s17 = scalar_lea.vmem %s56_s16, 8192  ;;  %p826_p6 = scmp.lt.s32.totalorder %s56_s16, %s56_s16 }
  0x10   :  { %p822_p5 = scmp.ne.s32.totalorder %s56_s16, %s821_s17  ;;  %p827_p7 = scmp.lt.s32.totalorder %s821_s17, %s821_s17 }
  0x12   :  { %p828_p8 = por %p827_p7, %p826_p6 }
  0x14   :  { %p829_p9 = pnand %p828_p8, %p822_p5 }
  0x16   :  { %832 = shalt.err (!%p829_p9)
}
  0x17   :  { %61 = dma.hbm_to_vmem [thread:$0]  %s1260_s9, 8192, %s56_s16, [#allocation7], %s838_s28, %s838_s28, %s839_s29  }
  0x18   :  { %833 = dma.done.wait [#allocation5], 8192  }
  0x19   :  { %834 = vsyncadd [#allocation5], 4294959104 }
  0x1a   :  { %835 = dma.done.wait [#allocation7], 8192  }
  0x1b   :  { %836 = vsyncadd [#allocation7], 4294959104  ;;  %v841_v0 = vmov 0.0   ;;  %v78_v1 = vld [vmem:[%s1254_s3 + $0x8] sm:$0xff]  ;;  %v77_v2 = vld [vmem:[%s1254_s3] sm:$0xff]  ;;  %vm91_vm0 = vcmask 64512  }
  0x1c   :  { %159 = vmatprep.mubr.f32.mxu0 %v841_v0  ;;  %v76_v3 = vld [vmem:[%s1253_s2] sm:$0xff]  ;;  %125 = vmatprep.subr.mxu0 %v78_v1  ;;  %v199_v4 = vld [vmem:[%s1256_s5 + $0xf8] sm:$0xff]  ;;  %v198_v5 = vld [vmem:[%s1256_s5 + $0xf0] sm:$0xff] }
  0x1d   :  { %v197_v6 = vld [vmem:[%s1256_s5 + $0xe8] sm:$0xff]  ;;  %126 = vmatpush1.msra.mxu0 %v77_v2  ;;  %244 = vmatprep.subr.mxu1 %v199_v4  ;;  %v196_v7 = vld [vmem:[%s1256_s5 + $0xe0] sm:$0xff]  ;;  %v195_v8 = vld [vmem:[%s1256_s5 + $0xd8] sm:$0xff] }
  0x1e   :  { %735 = vmatmul.mubr.msk.f32.vlgmr.msra.gmra.mxu0 %vm91_vm0, %v76_v3  ;;  %245 = vmatpush1.msra.mxu1 %v198_v5  ;;  %v194_v9 = vld [vmem:[%s1256_s5 + $0xd0] sm:$0xff]  ;;  %v193_v10 = vld [vmem:[%s1256_s5 + $0xc8] sm:$0xff]  ;;  %v192_v11 = vld [vmem:[%s1256_s5 + $0xc0] sm:$0xff] }
  0x1f   :  { %246 = vmatprep.subr.mxu1 %v197_v6  ;;  %v191_v12 = vld [vmem:[%s1256_s5 + $0xb8] sm:$0xff]  ;;  %v190_v13 = vld [vmem:[%s1256_s5 + $0xb0] sm:$0xff]  ;;  %v189_v14 = vld [vmem:[%s1256_s5 + $0xa8] sm:$0xff] }
  0x20   :  { %247 = vmatpush1.msra.mxu1 %v196_v7  ;;  %v188_v15 = vld [vmem:[%s1256_s5 + $0xa0] sm:$0xff]  ;;  %v187_v16 = vld [vmem:[%s1256_s5 + $0x98] sm:$0xff]  ;;  %v186_v17 = vld [vmem:[%s1256_s5 + $0x90] sm:$0xff] }
  0x21   :  { %248 = vmatprep.subr.mxu1 %v195_v8  ;;  %v185_v18 = vld [vmem:[%s1256_s5 + $0x88] sm:$0xff]  ;;  %v184_v19 = vld [vmem:[%s1256_s5 + $0x80] sm:$0xff]  ;;  %v183_v20 = vld [vmem:[%s1256_s5 + $0x78] sm:$0xff] }
  0x22   :  { %249 = vmatpush1.msra.mxu1 %v194_v9  ;;  %v182_v21 = vld [vmem:[%s1256_s5 + $0x70] sm:$0xff]  ;;  %v181_v22 = vld [vmem:[%s1256_s5 + $0x68] sm:$0xff]  ;;  %v180_v23 = vld [vmem:[%s1256_s5 + $0x60] sm:$0xff] }
  0x23   :  { %250 = vmatprep.subr.mxu1 %v193_v10  ;;  %v179_v24 = vld [vmem:[%s1256_s5 + $0x58] sm:$0xff]  ;;  %v178_v25 = vld [vmem:[%s1256_s5 + $0x50] sm:$0xff]  ;;  %v177_v26 = vld [vmem:[%s1256_s5 + $0x48] sm:$0xff] }
  0x24   :  { %251 = vmatpush1.msra.mxu1 %v192_v11  ;;  %v176_v27 = vld [vmem:[%s1256_s5 + $0x40] sm:$0xff]  ;;  %v175_v28 = vld [vmem:[%s1256_s5 + $0x38] sm:$0xff]  ;;  %v174_v29 = vld [vmem:[%s1256_s5 + $0x30] sm:$0xff] }
  0x25   :  { %252 = vmatprep.subr.mxu1 %v191_v12  ;;  %v173_v30 = vld [vmem:[%s1256_s5 + $0x28] sm:$0xff]  ;;  %v172_v31 = vld [vmem:[%s1256_s5 + $0x20] sm:$0xff]  ;;  %v171_v32 = vld [vmem:[%s1256_s5 + $0x18] sm:$0xff] }
  0x26   :  { %253 = vmatpush1.msra.mxu1 %v190_v13  ;;  %v170_v33 = vld [vmem:[%s1256_s5 + $0x10] sm:$0xff]  ;;  %v169_v34 = vld [vmem:[%s1256_s5 + $0x8] sm:$0xff]  ;;  %v168_v35 = vld [vmem:[%s1256_s5] sm:$0xff] }
  0x27   :  { %254 = vmatprep.subr.mxu1 %v189_v14  ;;  %v231_v36 = vld [vmem:[%s1256_s5 + $0x1f8] sm:$0xff]  ;;  %v230_v37 = vld [vmem:[%s1256_s5 + $0x1f0] sm:$0xff]  ;;  %v229_v38 = vld [vmem:[%s1256_s5 + $0x1e8] sm:$0xff] }
  0x28   :  { %255 = vmatpush1.msra.mxu1 %v188_v15  ;;  %v228_v39 = vld [vmem:[%s1256_s5 + $0x1e0] sm:$0xff]  ;;  %v227_v40 = vld [vmem:[%s1256_s5 + $0x1d8] sm:$0xff]  ;;  %v226_v41 = vld [vmem:[%s1256_s5 + $0x1d0] sm:$0xff] }
  0x29   :  { %256 = vmatprep.subr.mxu1 %v187_v16  ;;  %v225_v42 = vld [vmem:[%s1256_s5 + $0x1c8] sm:$0xff]  ;;  %v224_v43 = vld [vmem:[%s1256_s5 + $0x1c0] sm:$0xff]  ;;  %v223_v44 = vld [vmem:[%s1256_s5 + $0x1b8] sm:$0xff] }
  0x2a   :  { %257 = vmatpush1.msra.mxu1 %v186_v17  ;;  %v222_v45 = vld [vmem:[%s1256_s5 + $0x1b0] sm:$0xff]  ;;  %v221_v46 = vld [vmem:[%s1256_s5 + $0x1a8] sm:$0xff]  ;;  %v220_v47 = vld [vmem:[%s1256_s5 + $0x1a0] sm:$0xff] }
  0x2b   :  { %258 = vmatprep.subr.mxu1 %v185_v18  ;;  %v219_v48 = vld [vmem:[%s1256_s5 + $0x198] sm:$0xff]  ;;  %v218_v49 = vld [vmem:[%s1256_s5 + $0x190] sm:$0xff]  ;;  %v217_v50 = vld [vmem:[%s1256_s5 + $0x188] sm:$0xff] }
  0x2c   :  { %259 = vmatpush1.msra.mxu1 %v184_v19  ;;  %v216_v51 = vld [vmem:[%s1256_s5 + $0x180] sm:$0xff]  ;;  %v215_v52 = vld [vmem:[%s1256_s5 + $0x178] sm:$0xff]  ;;  %v214_v53 = vld [vmem:[%s1256_s5 + $0x170] sm:$0xff] }
  0x2d   :  { %260 = vmatprep.subr.mxu1 %v183_v20  ;;  %v213_v54 = vld [vmem:[%s1256_s5 + $0x168] sm:$0xff]  ;;  %v212_v55 = vld [vmem:[%s1256_s5 + $0x160] sm:$0xff]  ;;  %v211_v56 = vld [vmem:[%s1256_s5 + $0x158] sm:$0xff] }
  0x2e   :  { %261 = vmatpush1.msra.mxu1 %v182_v21  ;;  %v210_v57 = vld [vmem:[%s1256_s5 + $0x150] sm:$0xff]  ;;  %v209_v58 = vld [vmem:[%s1256_s5 + $0x148] sm:$0xff]  ;;  %v208_v59 = vld [vmem:[%s1256_s5 + $0x140] sm:$0xff] }
  0x2f   :  { %262 = vmatprep.subr.mxu1 %v181_v22  ;;  %v207_v60 = vld [vmem:[%s1256_s5 + $0x138] sm:$0xff]  ;;  %v206_v61 = vld [vmem:[%s1256_s5 + $0x130] sm:$0xff]  ;;  %v205_v62 = vld [vmem:[%s1256_s5 + $0x128] sm:$0xff] }
  0x30   :  { %263 = vmatpush1.msra.mxu1 %v180_v23  ;;  %v204_v63 = vld [vmem:[%s1256_s5 + $0x120] sm:$0xff]  ;;  %v203_v0 = vld [vmem:[%s1256_s5 + $0x118] sm:$0xff]  ;;  %v202_v1 = vld [vmem:[%s1256_s5 + $0x110] sm:$0xff] }
  0x31   :  { %264 = vmatprep.subr.mxu1 %v179_v24  ;;  %v201_v2 = vld [vmem:[%s1256_s5 + $0x108] sm:$0xff]  ;;  %v200_v3 = vld [vmem:[%s1256_s5 + $0x100] sm:$0xff]  ;;  %v348_v4 = vld [vmem:[#allocation4 + $0xf8] sm:$0xff] }
  0x32   :  { %265 = vmatpush1.msra.mxu1 %v178_v25  ;;  %v347_v5 = vld [vmem:[#allocation4 + $0xf0] sm:$0xff]  ;;  %v346_v6 = vld [vmem:[#allocation4 + $0xe8] sm:$0xff]  ;;  %393 = vmatprep.subr.mxu0 %v348_v4  ;;  %v345_v7 = vld [vmem:[#allocation4 + $0xe0] sm:$0xff] }
  0x33   :  { %266 = vmatprep.subr.mxu1 %v177_v26  ;;  %394 = vmatpush1.msra.mxu0 %v347_v5  ;;  %v344_v8 = vld [vmem:[#allocation4 + $0xd8] sm:$0xff]  ;;  %v343_v9 = vld [vmem:[#allocation4 + $0xd0] sm:$0xff]  ;;  %v342_v10 = vld [vmem:[#allocation4 + $0xc8] sm:$0xff] }
  0x34   :  { %267 = vmatpush1.msra.mxu1 %v176_v27  ;;  %395 = vmatprep.subr.mxu0 %v346_v6  ;;  %v341_v11 = vld [vmem:[#allocation4 + $0xc0] sm:$0xff]  ;;  %v340_v12 = vld [vmem:[#allocation4 + $0xb8] sm:$0xff]  ;;  %v339_v13 = vld [vmem:[#allocation4 + $0xb0] sm:$0xff] }
  0x35   :  { %268 = vmatprep.subr.mxu1 %v175_v28  ;;  %396 = vmatpush1.msra.mxu0 %v345_v7  ;;  %v338_v14 = vld [vmem:[#allocation4 + $0xa8] sm:$0xff]  ;;  %v337_v15 = vld [vmem:[#allocation4 + $0xa0] sm:$0xff]  ;;  %v336_v16 = vld [vmem:[#allocation4 + $0x98] sm:$0xff] }
  0x36   :  { %269 = vmatpush1.msra.mxu1 %v174_v29  ;;  %397 = vmatprep.subr.mxu0 %v344_v8  ;;  %v335_v17 = vld [vmem:[#allocation4 + $0x90] sm:$0xff]  ;;  %v334_v18 = vld [vmem:[#allocation4 + $0x88] sm:$0xff]  ;;  %v333_v19 = vld [vmem:[#allocation4 + $0x80] sm:$0xff] }
  0x37   :  { %270 = vmatprep.subr.mxu1 %v173_v30  ;;  %398 = vmatpush1.msra.mxu0 %v343_v9  ;;  %v332_v20 = vld [vmem:[#allocation4 + $0x78] sm:$0xff]  ;;  %v331_v21 = vld [vmem:[#allocation4 + $0x70] sm:$0xff]  ;;  %v330_v22 = vld [vmem:[#allocation4 + $0x68] sm:$0xff] }
  0x38   :  { %271 = vmatpush1.msra.mxu1 %v172_v31  ;;  %399 = vmatprep.subr.mxu0 %v342_v10  ;;  %v329_v23 = vld [vmem:[#allocation4 + $0x60] sm:$0xff]  ;;  %v328_v24 = vld [vmem:[#allocation4 + $0x58] sm:$0xff]  ;;  %v327_v25 = vld [vmem:[#allocation4 + $0x50] sm:$0xff] }
  0x39   :  { %272 = vmatprep.subr.mxu1 %v171_v32  ;;  %400 = vmatpush1.msra.mxu0 %v341_v11  ;;  %v326_v26 = vld [vmem:[#allocation4 + $0x48] sm:$0xff]  ;;  %v325_v27 = vld [vmem:[#allocation4 + $0x40] sm:$0xff]  ;;  %v324_v28 = vld [vmem:[#allocation4 + $0x38] sm:$0xff] }
  0x3a   :  { %273 = vmatpush1.msra.mxu1 %v170_v33  ;;  %401 = vmatprep.subr.mxu0 %v340_v12  ;;  %v323_v29 = vld [vmem:[#allocation4 + $0x30] sm:$0xff]  ;;  %v322_v30 = vld [vmem:[#allocation4 + $0x28] sm:$0xff]  ;;  %v321_v31 = vld [vmem:[#allocation4 + $0x20] sm:$0xff] }
  0x3b   :  { %274 = vmatprep.subr.mxu1 %v169_v34  ;;  %402 = vmatpush1.msra.mxu0 %v339_v13  ;;  %v320_v32 = vld [vmem:[#allocation4 + $0x18] sm:$0xff]  ;;  %v319_v33 = vld [vmem:[#allocation4 + $0x10] sm:$0xff]  ;;  %v318_v34 = vld [vmem:[#allocation4 + $0x8] sm:$0xff] }
  0x3c   :  { %275 = vmatpush1.msra.mxu1 %v168_v35  ;;  %403 = vmatprep.subr.mxu0 %v338_v14  ;;  %v317_v35 = vld [vmem:[#allocation4] sm:$0xff]  ;;  %v360_v5 = vld [vmem:[#allocation4 + $0x158] sm:$0xff]  ;;  %v359_v6 = vld [vmem:[#allocation4 + $0x150] sm:$0xff] }
  0x3d   :  { %276 = vmatprep.subr.mxu1 %v231_v36  ;;  %404 = vmatpush1.msra.mxu0 %v337_v15  ;;  %v380_v36 = vld [vmem:[#allocation4 + $0x1f8] sm:$0xff]  ;;  %v361_v4 = vld [vmem:[#allocation4 + $0x160] sm:$0xff]  ;;  %v358_v7 = vld [vmem:[#allocation4 + $0x148] sm:$0xff] }
  0x3e   :  { %277 = vmatpush2.msra.mxu1 %v230_v37  ;;  %405 = vmatprep.subr.mxu0 %v336_v16  ;;  %v379_v37 = vld [vmem:[#allocation4 + $0x1f0] sm:$0xff]  ;;  %v357_v8 = vld [vmem:[#allocation4 + $0x140] sm:$0xff]  ;;  %v356_v9 = vld [vmem:[#allocation4 + $0x138] sm:$0xff] }
  0x3f   :  { %278 = vmatprep.subr.mxu1 %v229_v38  ;;  %406 = vmatpush1.msra.mxu0 %v335_v17  ;;  %v378_v38 = vld [vmem:[#allocation4 + $0x1e8] sm:$0xff]  ;;  %v355_v10 = vld [vmem:[#allocation4 + $0x130] sm:$0xff]  ;;  %v353_v12 = vld [vmem:[#allocation4 + $0x120] sm:$0xff] }
  0x40   :  { %279 = vmatpush2.msra.mxu1 %v228_v39  ;;  %407 = vmatprep.subr.mxu0 %v334_v18  ;;  %v377_v39 = vld [vmem:[#allocation4 + $0x1e0] sm:$0xff]  ;;  %v354_v11 = vld [vmem:[#allocation4 + $0x128] sm:$0xff]  ;;  %v352_v13 = vld [vmem:[#allocation4 + $0x118] sm:$0xff] }
  0x41   :  { %280 = vmatprep.subr.mxu1 %v227_v40  ;;  %408 = vmatpush1.msra.mxu0 %v333_v19  ;;  %v376_v40 = vld [vmem:[#allocation4 + $0x1d8] sm:$0xff]  ;;  %v351_v14 = vld [vmem:[#allocation4 + $0x110] sm:$0xff]  ;;  %v350_v15 = vld [vmem:[#allocation4 + $0x108] sm:$0xff] }
  0x42   :  { %281 = vmatpush2.msra.mxu1 %v226_v41  ;;  %409 = vmatprep.subr.mxu0 %v332_v20  ;;  %v375_v41 = vld [vmem:[#allocation4 + $0x1d0] sm:$0xff]  ;;  %v349_v16 = vld [vmem:[#allocation4 + $0x100] sm:$0xff]  ;;  %v497_v17 = vld [vmem:[#allocation6 + $0xf8] sm:$0xff] }
  0x43   :  { %282 = vmatprep.subr.mxu1 %v225_v42  ;;  %410 = vmatpush1.msra.mxu0 %v331_v21  ;;  %v374_v42 = vld [vmem:[#allocation4 + $0x1c8] sm:$0xff]  ;;  %v496_v18 = vld [vmem:[#allocation6 + $0xf0] sm:$0xff]  ;;  %v494_v20 = vld [vmem:[#allocation6 + $0xe0] sm:$0xff] }
  0x44   :  { %283 = vmatpush2.msra.mxu1 %v224_v43  ;;  %411 = vmatprep.subr.mxu0 %v330_v22  ;;  %v373_v43 = vld [vmem:[#allocation4 + $0x1c0] sm:$0xff]  ;;  %v495_v19 = vld [vmem:[#allocation6 + $0xe8] sm:$0xff]  ;;  %v493_v21 = vld [vmem:[#allocation6 + $0xd8] sm:$0xff] }
  0x45   :  { %284 = vmatprep.subr.mxu1 %v223_v44  ;;  %412 = vmatpush1.msra.mxu0 %v329_v23  ;;  %v372_v44 = vld [vmem:[#allocation4 + $0x1b8] sm:$0xff]  ;;  %v492_v22 = vld [vmem:[#allocation6 + $0xd0] sm:$0xff]  ;;  %v491_v23 = vld [vmem:[#allocation6 + $0xc8] sm:$0xff] }
  0x46   :  { %285 = vmatpush2.msra.mxu1 %v222_v45  ;;  %413 = vmatprep.subr.mxu0 %v328_v24  ;;  %v371_v45 = vld [vmem:[#allocation4 + $0x1b0] sm:$0xff]  ;;  %v490_v24 = vld [vmem:[#allocation6 + $0xc0] sm:$0xff] }
  0x47   :  { %286 = vmatprep.subr.mxu1 %v221_v46  ;;  %414 = vmatpush1.msra.mxu0 %v327_v25  ;;  %v370_v46 = vld [vmem:[#allocation4 + $0x1a8] sm:$0xff]  ;;  %v489_v25 = vld [vmem:[#allocation6 + $0xb8] sm:$0xff] }
  0x48   :  { %287 = vmatpush2.msra.mxu1 %v220_v47  ;;  %415 = vmatprep.subr.mxu0 %v326_v26  ;;  %v369_v47 = vld [vmem:[#allocation4 + $0x1a0] sm:$0xff]  ;;  %v488_v26 = vld [vmem:[#allocation6 + $0xb0] sm:$0xff] }
  0x49   :  { %288 = vmatprep.subr.mxu1 %v219_v48  ;;  %416 = vmatpush1.msra.mxu0 %v325_v27  ;;  %v81_v48 = vlaneseq  ;;  %v487_v27 = vld [vmem:[#allocation6 + $0xa8] sm:$0xff] }
  0x4a   :  { %289 = vmatpush2.msra.mxu1 %v218_v49  ;;  %417 = vmatprep.subr.mxu0 %v324_v28  ;;  %v486_v28 = vld [vmem:[#allocation6 + $0xa0] sm:$0xff] }
  0x4b   :  { %290 = vmatprep.subr.mxu1 %v217_v50  ;;  %418 = vmatpush1.msra.mxu0 %v323_v29  ;;  %v82_v49 = vshrl.u32 %v81_v48, 7  ;;  %v485_v29 = vld [vmem:[#allocation6 + $0x98] sm:$0xff]  ;;  %v466_v48 = vld [vmem:[#allocation6] sm:$0xff] }
  0x4c   :  { %291 = vmatpush2.msra.mxu1 %v216_v51  ;;  %419 = vmatprep.subr.mxu0 %v322_v30  ;;  %v79_v51 = vld [vmem:[%s1255_s4] sm:$0x3]  ;;  %v484_v30 = vld [vmem:[#allocation6 + $0x90] sm:$0xff] }
  0x4d   :  { %292 = vmatprep.subr.mxu1 %v215_v52  ;;  %420 = vmatpush1.msra.mxu0 %v321_v31  ;;  %v1119_v50 = vsub.s32 0, %v82_v49  ;;  %v1124_v52 = vsub.s32 1, %v82_v49  ;;  %v483_v31 = vld [vmem:[#allocation6 + $0x88] sm:$0xff]  ;;  %v529_v49 = vld [vmem:[#allocation6 + $0x1f8] sm:$0xff] }
  0x4e   :  { %293 = vmatpush2.msra.mxu1 %v214_v53  ;;  %421 = vmatprep.subr.mxu0 %v320_v32  ;;  %v482_v32 = vld [vmem:[#allocation6 + $0x80] sm:$0xff] }
  0x4f   :  { %294 = vmatprep.subr.mxu1 %v213_v54  ;;  %422 = vmatpush1.msra.mxu0 %v319_v33  ;;  %v84_v53 = vrot.slane %v79_v51, %v1119_v50  ;;  %v88_v54 = vrot.slane %v79_v51, %v1124_v52  ;;  %v481_v33 = vld [vmem:[#allocation6 + $0x78] sm:$0xff]  ;;  %v528_v51 = vld [vmem:[#allocation6 + $0x1f0] sm:$0xff] }
  0x50   :  { %295 = vmatpush2.msra.mxu1 %v212_v55  ;;  %423 = vmatprep.subr.mxu0 %v318_v34  ;;  %v480_v34 = vld [vmem:[#allocation6 + $0x70] sm:$0xff] }
  0x51   :  { %296 = vmatprep.subr.mxu1 %v211_v56  ;;  %424 = vmatpush1.msra.mxu0 %v317_v35  ;;  %v479_v35 = vld [vmem:[#allocation6 + $0x68] sm:$0xff] }
  0x52   :  { %297 = vmatpush2.msra.mxu1 %v210_v57  ;;  %425 = vmatprep.subr.mxu0 %v380_v36  ;;  %v478_v36 = vld [vmem:[#allocation6 + $0x60] sm:$0xff] }
  0x53   :  { %298 = vmatprep.subr.mxu1 %v209_v58  ;;  %426 = vmatpush2.msra.mxu0 %v379_v37  ;;  %v477_v37 = vld [vmem:[#allocation6 + $0x58] sm:$0xff] }
  0x54   :  { %299 = vmatpush2.msra.mxu1 %v208_v59  ;;  %427 = vmatprep.subr.mxu0 %v378_v38  ;;  %v476_v38 = vld [vmem:[#allocation6 + $0x50] sm:$0xff] }
  0x55   :  { %300 = vmatprep.subr.mxu1 %v207_v60  ;;  %428 = vmatpush2.msra.mxu0 %v377_v39  ;;  %v475_v39 = vld [vmem:[#allocation6 + $0x48] sm:$0xff] }
  0x56   :  { %301 = vmatpush2.msra.mxu1 %v206_v61  ;;  %429 = vmatprep.subr.mxu0 %v376_v40  ;;  %v368_v61 = vld [vmem:[#allocation4 + $0x198] sm:$0xff]  ;;  %v474_v40 = vld [vmem:[#allocation6 + $0x40] sm:$0xff] }
  0x57   :  { %302 = vmatprep.subr.mxu1 %v205_v62  ;;  %430 = vmatpush2.msra.mxu0 %v375_v41  ;;  %v367_v62 = vld [vmem:[#allocation4 + $0x190] sm:$0xff]  ;;  %v473_v41 = vld [vmem:[#allocation6 + $0x38] sm:$0xff] }
  0x58   :  { %303 = vmatpush2.msra.mxu1 %v204_v63  ;;  %431 = vmatprep.subr.mxu0 %v374_v42  ;;  %v366_v63 = vld [vmem:[#allocation4 + $0x188] sm:$0xff]  ;;  %v472_v42 = vld [vmem:[#allocation6 + $0x30] sm:$0xff] }
  0x59   :  { %304 = vmatprep.subr.mxu1 %v203_v0  ;;  %432 = vmatpush2.msra.mxu0 %v373_v43  ;;  %v365_v0 = vld [vmem:[#allocation4 + $0x180] sm:$0xff]  ;;  %v471_v43 = vld [vmem:[#allocation6 + $0x28] sm:$0xff] }
  0x5a   :  { %305 = vmatpush2.msra.mxu1 %v202_v1  ;;  %433 = vmatprep.subr.mxu0 %v372_v44  ;;  %v364_v1 = vld [vmem:[#allocation4 + $0x178] sm:$0xff]  ;;  %v470_v44 = vld [vmem:[#allocation6 + $0x20] sm:$0xff] }
  0x5b   :  { %306 = vmatprep.subr.mxu1 %v201_v2  ;;  %434 = vmatpush2.msra.mxu0 %v371_v45  ;;  %v363_v2 = vld [vmem:[#allocation4 + $0x170] sm:$0xff]  ;;  %v469_v45 = vld [vmem:[#allocation6 + $0x18] sm:$0xff] }
  0x5c   :  { %307 = vmatpush2.msra.mxu1 %v200_v3  ;;  %435 = vmatprep.subr.mxu0 %v370_v46  ;;  %v362_v3 = vld [vmem:[#allocation4 + $0x168] sm:$0xff]  ;;  %v468_v46 = vld [vmem:[#allocation6 + $0x10] sm:$0xff] }
  0x5d   :  { %436 = vmatpush2.msra.mxu0 %v369_v47  ;;  %542 = vmatprep.subr.mxu1 %v497_v17  ;;  %v467_v47 = vld [vmem:[#allocation6 + $0x8] sm:$0xff]  ;;  %v508_v17 = vld [vmem:[#allocation6 + $0x150] sm:$0xff] }
  0x5e   :  { %437 = vmatprep.subr.mxu0 %v368_v61  ;;  %v519_v61 = vld [vmem:[#allocation6 + $0x1a8] sm:$0xff] }
  0x5f   :  { %438 = vmatpush2.msra.mxu0 %v367_v62  ;;  %v518_v62 = vld [vmem:[#allocation6 + $0x1a0] sm:$0xff] }
  0x60   :  { %439 = vmatprep.subr.mxu0 %v366_v63  ;;  %v232_v63 = vld [vmem:[%s1257_s6] sm:$0x3] }
  0x61   :  { %440 = vmatpush2.msra.mxu0 %v365_v0  ;;  %v237_v0 = vrot.slane %v232_v63, %v1119_v50 }
  0x62   :  { %441 = vmatprep.subr.mxu0 %v364_v1  ;;  %v241_v1 = vrot.slane %v232_v63, %v1124_v52  ;;  %v634_v63 = vld [vmem:[%s1262_s11 + $0x98] sm:$0xff] }
  0x63   :  { %442 = vmatpush2.msra.mxu0 %v363_v2 }
  0x64   :  { %443 = vmatprep.subr.mxu0 %v362_v3 }
  0x65   :  { %444 = vmatpush2.msra.mxu0 %v361_v4 }
  0x66   :  { %445 = vmatprep.subr.mxu0 %v360_v5 }
  0x67   :  { %446 = vmatpush2.msra.mxu0 %v359_v6 }
  0x68   :  { %447 = vmatprep.subr.mxu0 %v358_v7 }
  0x69   :  { %448 = vmatpush2.msra.mxu0 %v357_v8  ;;  %v517_v8 = vld [vmem:[#allocation6 + $0x198] sm:$0xff] }
  0x6a   :  { %449 = vmatprep.subr.mxu0 %v356_v9  ;;  %v516_v9 = vld [vmem:[#allocation6 + $0x190] sm:$0xff] }
  0x6b   :  { %450 = vmatpush2.msra.mxu0 %v355_v10  ;;  %v515_v10 = vld [vmem:[#allocation6 + $0x188] sm:$0xff] }
  0x6c   :  { %451 = vmatprep.subr.mxu0 %v354_v11  ;;  %v514_v11 = vld [vmem:[#allocation6 + $0x180] sm:$0xff] }
  0x6d   :  { %452 = vmatpush2.msra.mxu0 %v353_v12  ;;  %v513_v12 = vld [vmem:[#allocation6 + $0x178] sm:$0xff] }
  0x6e   :  { %453 = vmatprep.subr.mxu0 %v352_v13  ;;  %v512_v13 = vld [vmem:[#allocation6 + $0x170] sm:$0xff] }
  0x6f   :  { %454 = vmatpush2.msra.mxu0 %v351_v14  ;;  %v511_v14 = vld [vmem:[#allocation6 + $0x168] sm:$0xff] }
  0x70   :  { %455 = vmatprep.subr.mxu0 %v350_v15  ;;  %v510_v15 = vld [vmem:[#allocation6 + $0x160] sm:$0xff] }
  0x71   :  { %456 = vmatpush2.msra.mxu0 %v349_v16  ;;  %v509_v16 = vld [vmem:[#allocation6 + $0x158] sm:$0xff] }
  0xde   :  { %v161_v55 = vpop.f32.mrf.mxu0 }
  0xdf   :  { %v162_v56 = vadd.f32 %v161_v55, %v84_v53  ;;  %v527_v53 = vld [vmem:[#allocation6 + $0x1e8] sm:$0xff]  ;;  %v525_v55 = vld [vmem:[#allocation6 + $0x1d8] sm:$0xff] }
  0xe0   :  { %v163_v57 = vpop.f32.mrf.mxu0 }
  0xe1   :  { %v164_v58 = vadd.f32 %v163_v57, %v88_v54  ;;  %v526_v54 = vld [vmem:[#allocation6 + $0x1e0] sm:$0xff]  ;;  %v523_v57 = vld [vmem:[#allocation6 + $0x1c8] sm:$0xff] }
  0xe3   :  { %777 = vtanh.f32 %v164_v58  ;;  %v522_v58 = vld [vmem:[#allocation6 + $0x1c0] sm:$0xff] }
  0xe4   :  { %779 = vtanh.f32 %v162_v56  ;;  %v524_v56 = vld [vmem:[#allocation6 + $0x1d0] sm:$0xff] }
  0xf0   :  { %v778_v59 = vpop.eup %777 }
  0xf1   :  { %v780_v60 = vpop.eup %779  ;;  %308 = vmatprep.mubr.f32.mxu1 %v778_v59  ;;  %v521_v59 = vld [vmem:[#allocation6 + $0x1b8] sm:$0xff] }
  0xf2   :  { %309 = vmatmul.mubr.f32.vlgmr.msra.gmra.mxu1 %v780_v60  ;;  %v520_v60 = vld [vmem:[#allocation6 + $0x1b0] sm:$0xff] }
  0xf3   :  { %543 = vmatpush1.msra.mxu1 %v496_v18  ;;  %v507_v18 = vld [vmem:[#allocation6 + $0x148] sm:$0xff] }
  0xf4   :  { %544 = vmatprep.subr.mxu1 %v495_v19  ;;  %v506_v19 = vld [vmem:[#allocation6 + $0x140] sm:$0xff] }
  0xf5   :  { %545 = vmatpush1.msra.mxu1 %v494_v20  ;;  %v505_v20 = vld [vmem:[#allocation6 + $0x138] sm:$0xff] }
  0xf6   :  { %546 = vmatprep.subr.mxu1 %v493_v21  ;;  %v504_v21 = vld [vmem:[#allocation6 + $0x130] sm:$0xff] }
  0xf7   :  { %547 = vmatpush1.msra.mxu1 %v492_v22  ;;  %v503_v22 = vld [vmem:[#allocation6 + $0x128] sm:$0xff] }
  0xf8   :  { %548 = vmatprep.subr.mxu1 %v491_v23  ;;  %v502_v23 = vld [vmem:[#allocation6 + $0x120] sm:$0xff] }
  0xf9   :  { %549 = vmatpush1.msra.mxu1 %v490_v24  ;;  %v501_v24 = vld [vmem:[#allocation6 + $0x118] sm:$0xff] }
  0xfa   :  { %550 = vmatprep.subr.mxu1 %v489_v25  ;;  %v500_v25 = vld [vmem:[#allocation6 + $0x110] sm:$0xff] }
  0xfb   :  { %551 = vmatpush1.msra.mxu1 %v488_v26  ;;  %v499_v26 = vld [vmem:[#allocation6 + $0x108] sm:$0xff] }
  0xfc   :  { %552 = vmatprep.subr.mxu1 %v487_v27  ;;  %v498_v27 = vld [vmem:[#allocation6 + $0x100] sm:$0xff] }
  0xfd   :  { %553 = vmatpush1.msra.mxu1 %v486_v28  ;;  %v646_v28 = vld [vmem:[%s1262_s11 + $0xf8] sm:$0xff] }
  0xfe   :  { %554 = vmatprep.subr.mxu1 %v485_v29  ;;  %v630_v29 = vld [vmem:[%s1262_s11 + $0x78] sm:$0xff]  ;;  %737 = vmatprep.subr.mxu0 %v646_v28 }
  0xff   :  { %555 = vmatpush1.msra.mxu1 %v484_v30  ;;  %v645_v30 = vld [vmem:[%s1262_s11 + $0xf0] sm:$0xff] }
 0x100   :  { %556 = vmatprep.subr.mxu1 %v483_v31  ;;  %v629_v31 = vld [vmem:[%s1262_s11 + $0x70] sm:$0xff] }
 0x101   :  { %557 = vmatpush1.msra.mxu1 %v482_v32  ;;  %v644_v32 = vld [vmem:[%s1262_s11 + $0xe8] sm:$0xff] }
 0x102   :  { %558 = vmatprep.subr.mxu1 %v481_v33  ;;  %v628_v33 = vld [vmem:[%s1262_s11 + $0x68] sm:$0xff] }
 0x103   :  { %559 = vmatpush1.msra.mxu1 %v480_v34  ;;  %v643_v34 = vld [vmem:[%s1262_s11 + $0xe0] sm:$0xff] }
 0x104   :  { %560 = vmatprep.subr.mxu1 %v479_v35  ;;  %v627_v35 = vld [vmem:[%s1262_s11 + $0x60] sm:$0xff] }
 0x105   :  { %561 = vmatpush1.msra.mxu1 %v478_v36  ;;  %v642_v36 = vld [vmem:[%s1262_s11 + $0xd8] sm:$0xff] }
 0x106   :  { %562 = vmatprep.subr.mxu1 %v477_v37  ;;  %v626_v37 = vld [vmem:[%s1262_s11 + $0x58] sm:$0xff] }
 0x107   :  { %563 = vmatpush1.msra.mxu1 %v476_v38  ;;  %v641_v38 = vld [vmem:[%s1262_s11 + $0xd0] sm:$0xff] }
 0x108   :  { %564 = vmatprep.subr.mxu1 %v475_v39  ;;  %v625_v39 = vld [vmem:[%s1262_s11 + $0x50] sm:$0xff] }
 0x109   :  { %565 = vmatpush1.msra.mxu1 %v474_v40  ;;  %v381_v40 = vld [vmem:[%s1259_s8] sm:$0x3] }
 0x10a   :  { %566 = vmatprep.subr.mxu1 %v473_v41  ;;  %v386_v41 = vrot.slane %v381_v40, %v1119_v50 }
 0x10b   :  { %567 = vmatpush1.msra.mxu1 %v472_v42  ;;  %v390_v42 = vrot.slane %v381_v40, %v1124_v52 }
 0x10c   :  { %568 = vmatprep.subr.mxu1 %v471_v43 }
 0x10d   :  { %569 = vmatpush1.msra.mxu1 %v470_v44 }
 0x10e   :  { %570 = vmatprep.subr.mxu1 %v469_v45 }
 0x10f   :  { %571 = vmatpush1.msra.mxu1 %v468_v46 }
 0x110   :  { %572 = vmatprep.subr.mxu1 %v467_v47 }
 0x111   :  { %573 = vmatpush1.msra.mxu1 %v466_v48 }
 0x112   :  { %574 = vmatprep.subr.mxu1 %v529_v49  ;;  %v640_v49 = vld [vmem:[%s1262_s11 + $0xc8] sm:$0xff] }
 0x113   :  { %575 = vmatpush2.msra.mxu1 %v528_v51  ;;  %v624_v51 = vld [vmem:[%s1262_s11 + $0x48] sm:$0xff] }
 0x114   :  { %576 = vmatprep.subr.mxu1 %v527_v53  ;;  %v639_v53 = vld [vmem:[%s1262_s11 + $0xc0] sm:$0xff] }
 0x115   :  { %577 = vmatpush2.msra.mxu1 %v526_v54  ;;  %v623_v54 = vld [vmem:[%s1262_s11 + $0x40] sm:$0xff] }
 0x116   :  { %578 = vmatprep.subr.mxu1 %v525_v55  ;;  %v638_v55 = vld [vmem:[%s1262_s11 + $0xb8] sm:$0xff] }
 0x117   :  { %579 = vmatpush2.msra.mxu1 %v524_v56  ;;  %v622_v56 = vld [vmem:[%s1262_s11 + $0x38] sm:$0xff] }
 0x118   :  { %580 = vmatprep.subr.mxu1 %v523_v57  ;;  %v637_v57 = vld [vmem:[%s1262_s11 + $0xb0] sm:$0xff] }
 0x119   :  { %581 = vmatpush2.msra.mxu1 %v522_v58  ;;  %v621_v58 = vld [vmem:[%s1262_s11 + $0x30] sm:$0xff] }
 0x11a   :  { %582 = vmatprep.subr.mxu1 %v521_v59  ;;  %v636_v59 = vld [vmem:[%s1262_s11 + $0xa8] sm:$0xff] }
 0x11b   :  { %583 = vmatpush2.msra.mxu1 %v520_v60  ;;  %v620_v60 = vld [vmem:[%s1262_s11 + $0x28] sm:$0xff] }
 0x11c   :  { %584 = vmatprep.subr.mxu1 %v519_v61  ;;  %v635_v61 = vld [vmem:[%s1262_s11 + $0xa0] sm:$0xff] }
 0x11d   :  { %585 = vmatpush2.msra.mxu1 %v518_v62  ;;  %v619_v62 = vld [vmem:[%s1262_s11 + $0x20] sm:$0xff] }
 0x11e   :  { %586 = vmatprep.subr.mxu1 %v517_v8 }
 0x11f   :  { %587 = vmatpush2.msra.mxu1 %v516_v9 }
 0x120   :  { %588 = vmatprep.subr.mxu1 %v515_v10 }
 0x121   :  { %589 = vmatpush2.msra.mxu1 %v514_v11 }
 0x122   :  { %590 = vmatprep.subr.mxu1 %v513_v12 }
 0x123   :  { %591 = vmatpush2.msra.mxu1 %v512_v13 }
 0x124   :  { %592 = vmatprep.subr.mxu1 %v511_v14 }
 0x125   :  { %593 = vmatpush2.msra.mxu1 %v510_v15 }
 0x126   :  { %594 = vmatprep.subr.mxu1 %v509_v16 }
 0x127   :  { %595 = vmatpush2.msra.mxu1 %v508_v17  ;;  %v736_v17 = vld [vmem:[%s1263_s12] ss:$0 sm:$0xff] }
 0x128   :  { %596 = vmatprep.subr.mxu1 %v507_v18 }
 0x129   :  { %597 = vmatpush2.msra.mxu1 %v506_v19 }
 0x12a   :  { %598 = vmatprep.subr.mxu1 %v505_v20  ;;  %v726_v20 = vstv %s1251_s0 }
 0x12b   :  { %599 = vmatpush2.msra.mxu1 %v504_v21 }
 0x12c   :  { %600 = vmatprep.subr.mxu1 %v503_v22 }
 0x12d   :  { %601 = vmatpush2.msra.mxu1 %v502_v23 }
 0x12e   :  { %602 = vmatprep.subr.mxu1 %v501_v24 }
 0x12f   :  { %603 = vmatpush2.msra.mxu1 %v500_v25 }
 0x130   :  { %604 = vmatprep.subr.mxu1 %v499_v26 }
 0x131   :  { %605 = vmatpush2.msra.mxu1 %v498_v27 }
 0x1b2   :  { %v310_v2 = vpop.f32.mrf.mxu1 }
 0x1b3   :  { %v311_v3 = vadd.f32 %v310_v2, %v237_v0  ;;  %v618_v0 = vld [vmem:[%s1262_s11 + $0x18] sm:$0xff]  ;;  %v617_v2 = vld [vmem:[%s1262_s11 + $0x10] sm:$0xff] }
 0x1b4   :  { %v312_v4 = vpop.f32.mrf.mxu1 }
 0x1b5   :  { %v313_v5 = vadd.f32 %v312_v4, %v241_v1  ;;  %v633_v1 = vld [vmem:[%s1262_s11 + $0x90] sm:$0xff]  ;;  %v616_v4 = vld [vmem:[%s1262_s11 + $0x8] sm:$0xff] }
 0x1b7   :  { %781 = vtanh.f32 %v313_v5  ;;  %v631_v5 = vld [vmem:[%s1262_s11 + $0x80] sm:$0xff] }
 0x1b8   :  { %783 = vtanh.f32 %v311_v3  ;;  %v632_v3 = vld [vmem:[%s1262_s11 + $0x88] sm:$0xff] }
 0x1c4   :  { %v782_v6 = vpop.eup %781 }
 0x1c5   :  { %v784_v7 = vpop.eup %783  ;;  %457 = vmatprep.mubr.f32.mxu0 %v782_v6  ;;  %v615_v6 = vld [vmem:[%s1262_s11] sm:$0xff] }
 0x1c6   :  { %458 = vmatmul.mubr.f32.vlgmr.msra.gmra.mxu0 %v784_v7  ;;  %v530_v7 = vld [vmem:[%s1261_s10] sm:$0x3] }
 0x1c7   :  { %738 = vmatpush3.msra.mxu0 %v630_v29  ;;  %v535_v8 = vrot.slane %v530_v7, %v1119_v50  ;;  %v539_v9 = vrot.slane %v530_v7, %v1124_v52  ;;  %v724_v50 = vstv %s1252_s1 }
 0x1c8   :  { %739 = vmatprep.subr.mxu0 %v645_v30 }
 0x1c9   :  { %740 = vmatpush3.msra.mxu0 %v629_v31 }
 0x1ca   :  { %741 = vmatprep.subr.mxu0 %v644_v32 }
 0x1cb   :  { %742 = vmatpush3.msra.mxu0 %v628_v33 }
 0x1cc   :  { %743 = vmatprep.subr.mxu0 %v643_v34 }
 0x1cd   :  { %744 = vmatpush3.msra.mxu0 %v627_v35 }
 0x1ce   :  { %745 = vmatprep.subr.mxu0 %v642_v36 }
 0x1cf   :  { %746 = vmatpush3.msra.mxu0 %v626_v37 }
 0x1d0   :  { %747 = vmatprep.subr.mxu0 %v641_v38 }
 0x1d1   :  { %748 = vmatpush3.msra.mxu0 %v625_v39 }
 0x1d2   :  { %749 = vmatprep.subr.mxu0 %v640_v49 }
 0x1d3   :  { %750 = vmatpush3.msra.mxu0 %v624_v51 }
 0x1d4   :  { %751 = vmatprep.subr.mxu0 %v639_v53 }
 0x1d5   :  { %752 = vmatpush3.msra.mxu0 %v623_v54 }
 0x1d6   :  { %753 = vmatprep.subr.mxu0 %v638_v55 }
 0x1d7   :  { %754 = vmatpush3.msra.mxu0 %v622_v56 }
 0x1d8   :  { %755 = vmatprep.subr.mxu0 %v637_v57 }
 0x1d9   :  { %756 = vmatpush3.msra.mxu0 %v621_v58 }
 0x1da   :  { %757 = vmatprep.subr.mxu0 %v636_v59 }
 0x1db   :  { %758 = vmatpush3.msra.mxu0 %v620_v60 }
 0x1dc   :  { %759 = vmatprep.subr.mxu0 %v635_v61 }
 0x1dd   :  { %760 = vmatpush3.msra.mxu0 %v619_v62 }
 0x1de   :  { %761 = vmatprep.subr.mxu0 %v634_v63 }
 0x1df   :  { %762 = vmatpush3.msra.mxu0 %v618_v0 }
 0x1e0   :  { %763 = vmatprep.subr.mxu0 %v633_v1 }
 0x1e1   :  { %764 = vmatpush3.msra.mxu0 %v617_v2 }
 0x1e2   :  { %765 = vmatprep.subr.mxu0 %v632_v3 }
 0x1e3   :  { %766 = vmatpush3.msra.mxu0 %v616_v4 }
 0x1e4   :  { %767 = vmatprep.subr.mxu0 %v631_v5 }
 0x1e5   :  { %768 = vmatpush3.msra.mxu0 %v615_v6 }
 0x286   :  { %v459_v43 = vpop.f32.mrf.mxu0 }
 0x287   :  { %v460_v44 = vadd.f32 %v459_v43, %v386_v41 }
 0x288   :  { %v461_v45 = vpop.f32.mrf.mxu0 }
 0x289   :  { %v462_v46 = vadd.f32 %v461_v45, %v390_v42 }
 0x28b   :  { %785 = vtanh.f32 %v462_v46 }
 0x28c   :  { %787 = vtanh.f32 %v460_v44 }
 0x298   :  { %v786_v47 = vpop.eup %785 }
 0x299   :  { %v788_v48 = vpop.eup %787  ;;  %606 = vmatprep.mubr.f32.mxu1 %v786_v47 }
 0x29a   :  { %607 = vmatmul.mubr.f32.vlgmr.msra.gmra.mxu1 %v788_v48 }
 0x35a   :  { %v608_v10 = vpop.f32.mrf.mxu1 }
 0x35b   :  { %v609_v11 = vadd.f32 %v608_v10, %v535_v8 }
 0x35c   :  { %v610_v12 = vpop.f32.mrf.mxu1 }
 0x35d   :  { %v611_v13 = vadd.f32 %v610_v12, %v539_v9 }
 0x35f   :  { %789 = vtanh.f32 %v611_v13 }
 0x360   :  { %791 = vtanh.f32 %v609_v11 }
 0x36c   :  { %v790_v14 = vpop.eup %789 }
 0x36d   :  { %v792_v15 = vpop.eup %791  ;;  %718 = vmatprep.mubr.f32.mxu0 %v790_v14 }
 0x36e   :  { %719 = vmatmul.mubr.f32.vlgmr.msra.gmra.mxu0 %v792_v15 }
 0x42e   :  { %v769_v16 = vpop.f32.mrf.mxu0 }
 0x430   :  { %v770_v18 = vpop.f32.mrf.mxu0 }
 0x431   :  { %v771_v19 = vadd.f32 %v770_v18, %v769_v16 }
 0x433   :  { %v721_v52 = vadd.f32 %v771_v19, %v736_v17 }
 0x435   :  { %v725_v21 = vmul.f32 %v724_v50, %v721_v52 }
 0x437   :  { %v727_v22 = vadd.f32 %v726_v20, %v725_v21 }
 0x439   :  { %728 = vst [vmem:[%s1264_s13] sm:$0xff] %v727_v22 }
 0x43a   :  { %733 = vsyncpa [#allocation5], 1 }
 0x43b   :  { %734 = vsyncpa [#allocation7], 1 }

</bundles_post_ra>
